<compile_context>
chip_gen: v7x
topology: tpu7x:2x2x1
jax: 0.10.0
libtpu: 0.0.40
codegen_flags: <defaults>
</compile_context>

<pallas_src>
import jax
import jax.numpy as jnp
from jax.experimental import pallas as pl
from jax.experimental.pallas import tpu as pltpu


def dhrnn_kernel(x_ref, wih_ref, whh_ref, benc_ref, wdec_ref, bdec_ref,
                 y_ref, xp_scr):
    """x_ref:    [seq_len*B, enc_in]       time-major, flattened over (t, b)
       wih_ref:  [enc_in, d_model]
       whh_ref:  [d_model, d_model]
       benc_ref: [1, d_model]              (= b_ih + b_hh)
       wdec_ref: [d_model, d_model+enc_in] (= [W_out@W_ih + W_hh | W_out])
       bdec_ref: [1, d_model+enc_in]       (= [b_out@W_ih + b_ih + b_hh | b_out])
       y_ref:    [pred_len, B, enc_in]
       xp_scr:   [seq_len*B, d_model] VMEM scratch for the batched projection
    """
    pred_len, B, enc_in = y_ref.shape
    d_model = whh_ref.shape[0]
    seq_len = x_ref.shape[0] // B

    # ---- batched input projection: one MXU op for ALL time steps, with the
    # encode biases pre-folded.  This takes the x @ W_ih matmul off the
    # serial recurrence critical path.
    xp_scr[...] = (jnp.dot(x_ref[...], wih_ref[...],
                           preferred_element_type=jnp.float32)
                   + benc_ref[...])

    whh = whh_ref[...]
    wdec = wdec_ref[...]
    bdec = bdec_ref[...]

    # ---- encode: h_t = tanh(xp_t + h_{t-1} @ W_hh);  h stays in vregs ------
    # seq_len is a small compile-time constant -> fully unrolled Python loop
    # (static VMEM offsets; scheduler overlaps step t+1's load/push with
    # step t's tanh/drain).
    # TODO(synk): for production-length sequences use a time grid (or
    # lax.fori_loop with partial unroll) and stream x from HBM — matters on
    # v7x where VMEM is 64 MiB per TensorCore.
    h = jnp.zeros((B, d_model), jnp.float32)
    for t in range(seq_len):
        xt = xp_scr[pl.ds(t * B, B), :]
        h = jnp.tanh(xt + jnp.dot(h, whh, preferred_element_type=jnp.float32))

    # ---- decode: ONE fused matmul per autoregressive step ------------------
    #   z[:, :d_model]  -> pre-activation of the next hidden state (aligned)
    #   z[:, d_model:]  -> prediction y_p = h @ W_out + b_out
    # Per-step y stores are tiny masked vst's (enc_in=8 lanes); negligible at
    # these shapes — for large pred_len/enc_in accumulate and store lane-dense.
    for p in range(pred_len):
        z = jnp.dot(h, wdec, preferred_element_type=jnp.float32) + bdec
        y_ref[p] = z[:, d_model:d_model + enc_in]
        h = jnp.tanh(z[:, :d_model])


def model_forward(x_enc, params, pred_len):
    """x_enc: [B, seq_len, enc_in] (batch_first, as in the PyTorch Model)."""
    B, seq_len, enc_in = x_enc.shape
    d_model = params["W_hh"].shape[0]

    W_ih = params["W_ih"].astype(jnp.float32)    # [enc_in, d_model]
    W_hh = params["W_hh"].astype(jnp.float32)    # [d_model, d_model]
    b_enc = (params["b_ih"] + params["b_hh"]).astype(jnp.float32)  # [1, d_model]
    W_out = params["W_out"].astype(jnp.float32)  # [d_model, enc_in]
    b_out = params["b_out"].astype(jnp.float32)  # [1, enc_in]

    # Fused decode weights:  z = h @ W_dec + b_dec  ->  [next-h preact | y_p]
    #   h_next = tanh(h @ (W_out@W_ih + W_hh) + (b_out@W_ih + b_ih + b_hh))
    #   y_p    = h @ W_out + b_out
    W_dec = jnp.concatenate([W_out @ W_ih + W_hh, W_out], axis=1)
    b_dec = jnp.concatenate([b_out @ W_ih + b_enc, b_out], axis=1)

    # batch_first [B,T,F] -> time-major, flattened over (t, b): [T*B, F]
    x_flat = jnp.transpose(x_enc, (1, 0, 2)).reshape(seq_len * B, enc_in)
    x_flat = x_flat.astype(jnp.float32)

    y_tm = pl.pallas_call(
        dhrnn_kernel,
        out_shape=jax.ShapeDtypeStruct((pred_len, B, enc_in), jnp.float32),
        in_specs=[pl.BlockSpec(memory_space=pltpu.MemorySpace.VMEM)] * 6,
        out_specs=pl.BlockSpec(memory_space=pltpu.MemorySpace.VMEM),
        scratch_shapes=[pltpu.VMEM((seq_len * B, d_model), jnp.float32)],
    )(x_flat, W_ih, W_hh, b_enc, W_dec, b_dec)

    # [pred_len, B, enc_in] -> [B, pred_len, enc_in]  (== stack(dim=1).squeeze(2))
    return jnp.transpose(y_tm, (1, 0, 2))


def reference_forward(x_enc, params, pred_len):
    """Pure-JAX reference, faithful to the PyTorch op ordering."""
    B = x_enc.shape[0]
    d_model = params["W_hh"].shape[0]
    h = jnp.zeros((B, d_model), jnp.float32)

    def step(xt, h):
        return jnp.tanh(xt @ params["W_ih"] + params["b_ih"]
                        + h @ params["W_hh"] + params["b_hh"])

    for t in range(x_enc.shape[1]):
        h = step(x_enc[:, t, :], h)
    ys = []
    for _ in range(pred_len):
        yp = h @ params["W_out"] + params["b_out"]
        ys.append(yp)
        h = step(yp, h)
    return jnp.stack(ys, axis=1)


def init_params(key, enc_in, d_model):
    """Deterministic init mimicking PyTorch nn.RNN / nn.Linear uniform init."""
    k = jax.random.split(key, 6)
    s_rnn = 1.0 / jnp.sqrt(d_model)
    s_lin = 1.0 / jnp.sqrt(d_model)
    return {
        # stored pre-transposed: x @ W_ih has shape [B, d_model]
        "W_ih": jax.random.uniform(k[0], (enc_in, d_model), jnp.float32, -s_rnn, s_rnn),
        "W_hh": jax.random.uniform(k[1], (d_model, d_model), jnp.float32, -s_rnn, s_rnn),
        "b_ih": jax.random.uniform(k[2], (1, d_model), jnp.float32, -s_rnn, s_rnn),
        "b_hh": jax.random.uniform(k[3], (1, d_model), jnp.float32, -s_rnn, s_rnn),
        "W_out": jax.random.uniform(k[4], (d_model, enc_in), jnp.float32, -s_lin, s_lin),
        "b_out": jnp.zeros((1, enc_in), jnp.float32),
    }


if __name__ == "__main__":
    # Small shapes consistent with the Model's forward:
    #   x_enc: [batch, seq_len, enc_in]
    B, seq_len, pred_len, enc_in, d_model = 2, 8, 4, 8, 32

    key = jax.random.PRNGKey(0)
    kx, kp = jax.random.split(key)
    x_enc = jax.random.normal(kx, (B, seq_len, enc_in), jnp.float32)
    params = init_params(kp, enc_in, d_model)

    y = model_forward(x_enc, params, pred_len)
    y = jax.block_until_ready(y)

    y_ref = reference_forward(x_enc, params, pred_len)
    assert y.shape == (B, pred_len, enc_in), y.shape
    # The fused decode step reassociates a couple of f32 matmuls
    # (h@(W_out@W_ih) vs (h@W_out)@W_ih); allow a small tolerance on top of
    # normal MXU rounding.
    assert jnp.allclose(y, y_ref, atol=5e-5, rtol=5e-5), "mismatch vs reference"

    print("KERNEL_OK")
</pallas_src>

<mosaic_0001>
module attributes {stable_mosaic.version = 11 : i64} {
  func.func @dhrnn_kernel(%arg0: memref<16x8xf32, #tpu.memory_space<vmem>>, %arg1: memref<8x32xf32, #tpu.memory_space<vmem>>, %arg2: memref<32x32xf32, #tpu.memory_space<vmem>>, %arg3: memref<1x32xf32, #tpu.memory_space<vmem>>, %arg4: memref<32x40xf32, #tpu.memory_space<vmem>>, %arg5: memref<1x40xf32, #tpu.memory_space<vmem>>, %arg6: memref<4x2x8xf32, #tpu.memory_space<vmem>>, %arg7: memref<16x32xf32, #tpu.memory_space<vmem>>) attributes {dimension_semantics = [], scalar_prefetch = 0 : i64, scratch_operands = 1 : i64, tpu.core_type = #tpu.core_type<tc>} {
    %c0 = arith.constant 0 : index
    %c0_0 = arith.constant 0 : index
    %0 = vector.load %arg0[%c0, %c0_0] : memref<16x8xf32, #tpu.memory_space<vmem>>, vector<16x8xf32>
    %c0_1 = arith.constant 0 : index
    %c0_2 = arith.constant 0 : index
    %1 = vector.load %arg1[%c0_1, %c0_2] : memref<8x32xf32, #tpu.memory_space<vmem>>, vector<8x32xf32>
    %cst = arith.constant dense<0.000000e+00> : vector<16x32xf32>
    %2 = tpu.matmul %0, %1, %cst {dimension_numbers = #tpu.dot_dimension_numbers<[1], [0], [0], [1], [0, 0, 1, 1], [], []>} : vector<16x8xf32>, vector<8x32xf32>, vector<16x32xf32> -> vector<16x32xf32>
    %c0_3 = arith.constant 0 : index
    %c0_4 = arith.constant 0 : index
    %3 = vector.load %arg3[%c0_3, %c0_4] : memref<1x32xf32, #tpu.memory_space<vmem>>, vector<1x32xf32>
    %4 = vector.broadcast %3 : vector<1x32xf32> to vector<16x32xf32>
    %5 = arith.addf %2, %4 : vector<16x32xf32>
    %c0_5 = arith.constant 0 : index
    %c0_6 = arith.constant 0 : index
    %6 = vector.load %arg7[%c0_5, %c0_6] : memref<16x32xf32, #tpu.memory_space<vmem>>, vector<16x32xf32>
    tpu.vector_store %arg7[%c0_5, %c0_6], %5 {strides = array<i32>} : memref<16x32xf32, #tpu.memory_space<vmem>>, vector<16x32xf32>,
    %c0_7 = arith.constant 0 : index
    %c0_8 = arith.constant 0 : index
    %7 = vector.load %arg2[%c0_7, %c0_8] : memref<32x32xf32, #tpu.memory_space<vmem>>, vector<32x32xf32>
    %c0_9 = arith.constant 0 : index
    %c0_10 = arith.constant 0 : index
    %8 = vector.load %arg4[%c0_9, %c0_10] : memref<32x40xf32, #tpu.memory_space<vmem>>, vector<32x40xf32>
    %c0_11 = arith.constant 0 : index
    %c0_12 = arith.constant 0 : index
    %9 = vector.load %arg5[%c0_11, %c0_12] : memref<1x40xf32, #tpu.memory_space<vmem>>, vector<1x40xf32>
    %cst_13 = arith.constant 0.000000e+00 : f32
    %10 = vector.broadcast %cst_13 : f32 to vector<2x32xf32>
    %c0_14 = arith.constant 0 : index
    %c0_15 = arith.constant 0 : index
    %11 = vector.load %arg7[%c0_14, %c0_15] : memref<16x32xf32, #tpu.memory_space<vmem>>, vector<2x32xf32>
    %cst_16 = arith.constant dense<0.000000e+00> : vector<2x32xf32>
    %12 = tpu.matmul %10, %7, %cst_16 {dimension_numbers = #tpu.dot_dimension_numbers<[1], [0], [0], [1], [0, 0, 1, 1], [], []>} : vector<2x32xf32>, vector<32x32xf32>, vector<2x32xf32> -> vector<2x32xf32>
    %13 = arith.addf %11, %12 : vector<2x32xf32>
    %14 = math.tanh %13 : vector<2x32xf32>
    %c2 = arith.constant 2 : index
    %c0_17 = arith.constant 0 : index
    %15 = vector.load %arg7[%c2, %c0_17] : memref<16x32xf32, #tpu.memory_space<vmem>>, vector<2x32xf32>
    %cst_18 = arith.constant dense<0.000000e+00> : vector<2x32xf32>
    %16 = tpu.matmul %14, %7, %cst_18 {dimension_numbers = #tpu.dot_dimension_numbers<[1], [0], [0], [1], [0, 0, 1, 1], [], []>} : vector<2x32xf32>, vector<32x32xf32>, vector<2x32xf32> -> vector<2x32xf32>
    %17 = arith.addf %15, %16 : vector<2x32xf32>
    %18 = math.tanh %17 : vector<2x32xf32>
    %c4 = arith.constant 4 : index
    %c0_19 = arith.constant 0 : index
    %19 = vector.load %arg7[%c4, %c0_19] : memref<16x32xf32, #tpu.memory_space<vmem>>, vector<2x32xf32>
    %cst_20 = arith.constant dense<0.000000e+00> : vector<2x32xf32>
    %20 = tpu.matmul %18, %7, %cst_20 {dimension_numbers = #tpu.dot_dimension_numbers<[1], [0], [0], [1], [0, 0, 1, 1], [], []>} : vector<2x32xf32>, vector<32x32xf32>, vector<2x32xf32> -> vector<2x32xf32>
    %21 = arith.addf %19, %20 : vector<2x32xf32>
    %22 = math.tanh %21 : vector<2x32xf32>
    %c6 = arith.constant 6 : index
    %c0_21 = arith.constant 0 : index
    %23 = vector.load %arg7[%c6, %c0_21] : memref<16x32xf32, #tpu.memory_space<vmem>>, vector<2x32xf32>
    %cst_22 = arith.constant dense<0.000000e+00> : vector<2x32xf32>
    %24 = tpu.matmul %22, %7, %cst_22 {dimension_numbers = #tpu.dot_dimension_numbers<[1], [0], [0], [1], [0, 0, 1, 1], [], []>} : vector<2x32xf32>, vector<32x32xf32>, vector<2x32xf32> -> vector<2x32xf32>
    %25 = arith.addf %23, %24 : vector<2x32xf32>
    %26 = math.tanh %25 : vector<2x32xf32>
    %c8 = arith.constant 8 : index
    %c0_23 = arith.constant 0 : index
    %27 = vector.load %arg7[%c8, %c0_23] : memref<16x32xf32, #tpu.memory_space<vmem>>, vector<2x32xf32>
    %cst_24 = arith.constant dense<0.000000e+00> : vector<2x32xf32>
    %28 = tpu.matmul %26, %7, %cst_24 {dimension_numbers = #tpu.dot_dimension_numbers<[1], [0], [0], [1], [0, 0, 1, 1], [], []>} : vector<2x32xf32>, vector<32x32xf32>, vector<2x32xf32> -> vector<2x32xf32>
    %29 = arith.addf %27, %28 : vector<2x32xf32>
    %30 = math.tanh %29 : vector<2x32xf32>
    %c10 = arith.constant 10 : index
    %c0_25 = arith.constant 0 : index
    %31 = vector.load %arg7[%c10, %c0_25] : memref<16x32xf32, #tpu.memory_space<vmem>>, vector<2x32xf32>
    %cst_26 = arith.constant dense<0.000000e+00> : vector<2x32xf32>
    %32 = tpu.matmul %30, %7, %cst_26 {dimension_numbers = #tpu.dot_dimension_numbers<[1], [0], [0], [1], [0, 0, 1, 1], [], []>} : vector<2x32xf32>, vector<32x32xf32>, vector<2x32xf32> -> vector<2x32xf32>
    %33 = arith.addf %31, %32 : vector<2x32xf32>
    %34 = math.tanh %33 : vector<2x32xf32>
    %c12 = arith.constant 12 : index
    %c0_27 = arith.constant 0 : index
    %35 = vector.load %arg7[%c12, %c0_27] : memref<16x32xf32, #tpu.memory_space<vmem>>, vector<2x32xf32>
    %cst_28 = arith.constant dense<0.000000e+00> : vector<2x32xf32>
    %36 = tpu.matmul %34, %7, %cst_28 {dimension_numbers = #tpu.dot_dimension_numbers<[1], [0], [0], [1], [0, 0, 1, 1], [], []>} : vector<2x32xf32>, vector<32x32xf32>, vector<2x32xf32> -> vector<2x32xf32>
    %37 = arith.addf %35, %36 : vector<2x32xf32>
    %38 = math.tanh %37 : vector<2x32xf32>
    %c14 = arith.constant 14 : index
    %c0_29 = arith.constant 0 : index
    %39 = vector.load %arg7[%c14, %c0_29] : memref<16x32xf32, #tpu.memory_space<vmem>>, vector<2x32xf32>
    %cst_30 = arith.constant dense<0.000000e+00> : vector<2x32xf32>
    %40 = tpu.matmul %38, %7, %cst_30 {dimension_numbers = #tpu.dot_dimension_numbers<[1], [0], [0], [1], [0, 0, 1, 1], [], []>} : vector<2x32xf32>, vector<32x32xf32>, vector<2x32xf32> -> vector<2x32xf32>
    %41 = arith.addf %39, %40 : vector<2x32xf32>
    %42 = math.tanh %41 : vector<2x32xf32>
    %cst_31 = arith.constant dense<0.000000e+00> : vector<2x40xf32>
    %43 = tpu.matmul %42, %8, %cst_31 {dimension_numbers = #tpu.dot_dimension_numbers<[1], [0], [0], [1], [0, 0, 1, 1], [], []>} : vector<2x32xf32>, vector<32x40xf32>, vector<2x40xf32> -> vector<2x40xf32>
    %44 = vector.broadcast %9 : vector<1x40xf32> to vector<2x40xf32>
    %45 = arith.addf %43, %44 : vector<2x40xf32>
    %46 = vector.extract_strided_slice %45 {offsets = [0, 32], sizes = [2, 8], strides = [1, 1]} : vector<2x40xf32> to vector<2x8xf32>
    %c0_32 = arith.constant 0 : index
    %c0_33 = arith.constant 0 : index
    %c0_34 = arith.constant 0 : index
    %47 = vector.load %arg6[%c0_32, %c0_33, %c0_34] : memref<4x2x8xf32, #tpu.memory_space<vmem>>, vector<1x2x8xf32>
    %48 = vector.shape_cast %47 : vector<1x2x8xf32> to vector<2x8xf32>
    %49 = vector.shape_cast %46 : vector<2x8xf32> to vector<1x2x8xf32>
    tpu.vector_store %arg6[%c0_32, %c0_33, %c0_34], %49 {strides = array<i32>} : memref<4x2x8xf32, #tpu.memory_space<vmem>>, vector<1x2x8xf32>,
    %50 = vector.extract_strided_slice %45 {offsets = [0, 0], sizes = [2, 32], strides = [1, 1]} : vector<2x40xf32> to vector<2x32xf32>
    %51 = math.tanh %50 : vector<2x32xf32>
    %cst_35 = arith.constant dense<0.000000e+00> : vector<2x40xf32>
    %52 = tpu.matmul %51, %8, %cst_35 {dimension_numbers = #tpu.dot_dimension_numbers<[1], [0], [0], [1], [0, 0, 1, 1], [], []>} : vector<2x32xf32>, vector<32x40xf32>, vector<2x40xf32> -> vector<2x40xf32>
    %53 = vector.broadcast %9 : vector<1x40xf32> to vector<2x40xf32>
    %54 = arith.addf %52, %53 : vector<2x40xf32>
    %55 = vector.extract_strided_slice %54 {offsets = [0, 32], sizes = [2, 8], strides = [1, 1]} : vector<2x40xf32> to vector<2x8xf32>
    %c1 = arith.constant 1 : index
    %c0_36 = arith.constant 0 : index
    %c0_37 = arith.constant 0 : index
    %56 = vector.load %arg6[%c1, %c0_36, %c0_37] : memref<4x2x8xf32, #tpu.memory_space<vmem>>, vector<1x2x8xf32>
    %57 = vector.shape_cast %56 : vector<1x2x8xf32> to vector<2x8xf32>
    %58 = vector.shape_cast %55 : vector<2x8xf32> to vector<1x2x8xf32>
    tpu.vector_store %arg6[%c1, %c0_36, %c0_37], %58 {strides = array<i32>} : memref<4x2x8xf32, #tpu.memory_space<vmem>>, vector<1x2x8xf32>,
    %59 = vector.extract_strided_slice %54 {offsets = [0, 0], sizes = [2, 32], strides = [1, 1]} : vector<2x40xf32> to vector<2x32xf32>
    %60 = math.tanh %59 : vector<2x32xf32>
    %cst_38 = arith.constant dense<0.000000e+00> : vector<2x40xf32>
    %61 = tpu.matmul %60, %8, %cst_38 {dimension_numbers = #tpu.dot_dimension_numbers<[1], [0], [0], [1], [0, 0, 1, 1], [], []>} : vector<2x32xf32>, vector<32x40xf32>, vector<2x40xf32> -> vector<2x40xf32>
    %62 = vector.broadcast %9 : vector<1x40xf32> to vector<2x40xf32>
    %63 = arith.addf %61, %62 : vector<2x40xf32>
    %64 = vector.extract_strided_slice %63 {offsets = [0, 32], sizes = [2, 8], strides = [1, 1]} : vector<2x40xf32> to vector<2x8xf32>
    %c2_39 = arith.constant 2 : index
    %c0_40 = arith.constant 0 : index
    %c0_41 = arith.constant 0 : index
    %65 = vector.load %arg6[%c2_39, %c0_40, %c0_41] : memref<4x2x8xf32, #tpu.memory_space<vmem>>, vector<1x2x8xf32>
    %66 = vector.shape_cast %65 : vector<1x2x8xf32> to vector<2x8xf32>
    %67 = vector.shape_cast %64 : vector<2x8xf32> to vector<1x2x8xf32>
    tpu.vector_store %arg6[%c2_39, %c0_40, %c0_41], %67 {strides = array<i32>} : memref<4x2x8xf32, #tpu.memory_space<vmem>>, vector<1x2x8xf32>,
    %68 = vector.extract_strided_slice %63 {offsets = [0, 0], sizes = [2, 32], strides = [1, 1]} : vector<2x40xf32> to vector<2x32xf32>
    %69 = math.tanh %68 : vector<2x32xf32>
    %cst_42 = arith.constant dense<0.000000e+00> : vector<2x40xf32>
    %70 = tpu.matmul %69, %8, %cst_42 {dimension_numbers = #tpu.dot_dimension_numbers<[1], [0], [0], [1], [0, 0, 1, 1], [], []>} : vector<2x32xf32>, vector<32x40xf32>, vector<2x40xf32> -> vector<2x40xf32>
    %71 = vector.broadcast %9 : vector<1x40xf32> to vector<2x40xf32>
    %72 = arith.addf %70, %71 : vector<2x40xf32>
    %73 = vector.extract_strided_slice %72 {offsets = [0, 32], sizes = [2, 8], strides = [1, 1]} : vector<2x40xf32> to vector<2x8xf32>
    %c3 = arith.constant 3 : index
    %c0_43 = arith.constant 0 : index
    %c0_44 = arith.constant 0 : index
    %74 = vector.load %arg6[%c3, %c0_43, %c0_44] : memref<4x2x8xf32, #tpu.memory_space<vmem>>, vector<1x2x8xf32>
    %75 = vector.shape_cast %74 : vector<1x2x8xf32> to vector<2x8xf32>
    %76 = vector.shape_cast %73 : vector<2x8xf32> to vector<1x2x8xf32>
    tpu.vector_store %arg6[%c3, %c0_43, %c0_44], %76 {strides = array<i32>} : memref<4x2x8xf32, #tpu.memory_space<vmem>>, vector<1x2x8xf32>,
    return
  }
}

</mosaic_0001>

<bundles_post_ra>
// kernel: tpu_custom_call.1
= control target key start
LH: loop header
LB: loop body
LE: loop exit
PB: predicated region body
PF: predicated region fallthrough
CT: control target
= control target key end

     0   :  { %11 = vsyncpa [#allocation4], 0  ;;  %s1700_s0 = inlined_call_operand.vmem [shape: f32[16,8], index: 0, kind: input, shape index: {}]   ;;  %s1701_s1 = inlined_call_operand.hbm [shape: f32[8,32], index: 1, kind: input, shape index: {}]   ;;  %s1702_s2 = inlined_call_operand.hbm [shape: f32[32,32], index: 2, kind: input, shape index: {}]   ;;  %s1703_s3 = inlined_call_operand.vmem [shape: f32[1,32], index: 3, kind: input, shape index: {}]   ;;  %s1704_s4 = inlined_call_operand.vmem [shape: f32[32,40], index: 4, kind: input, shape index: {}]   ;;  %s1705_s5 = inlined_call_operand.vmem [shape: f32[1,40], index: 5, kind: input, shape index: {}]   ;;  %s1706_s6 = inlined_call_operand.hbm [shape: f32[4,2,8], index: 6, kind: output, shape index: {}]  }
   0x1   :  { %12 = vsyncpa [#allocation7], 0 }
   0x2   :  { %13 = vsyncpa [#allocation5], 0  ;;  %s1497_s21 = smov [#allocation3]   ;;  %s1498_s23 = smov [#allocation6]  }
   0x3   :  { %s22_s22 = sshll.u32 %s1497_s21, 4  ;;  %s31_s24 = sshll.u32 %s1498_s23, 4  ;;  %s23_s22 = int_to_ptr.vmem [resolvable:$true] %s22_s22  ;;  %s1543_s24 = int_to_ptr.vmem [resolvable:$true] %s31_s24 }
   0x4   :  { %s1425_s27 = scalar_lea.hbm %s1701_s1, 128 }
   0x5   :  { %p1426_p0 = scmp.ne.s32.totalorder %s1701_s1, %s1425_s27  ;;  %p1429_p1 = scmp.lt.u32.totalorder %s1425_s27, %s1701_s1 }
   0x7   :  { %p1431_p2 = pnand %p1429_p1, %p1426_p0 }
   0x9   :  { %1434 = shalt.err (!%p1431_p2)
}
   0xa   :  { %s1435_s8 = scalar_lea.vmem %s23_s22, 128  ;;  %p1440_p4 = scmp.lt.s32.totalorder %s23_s22, %s23_s22 }
   0xb   :  { %p1436_p3 = scmp.ne.s32.totalorder %s23_s22, %s1435_s8  ;;  %p1441_p5 = scmp.lt.s32.totalorder %s1435_s8, %s1435_s8 }
   0xd   :  { %p1442_p6 = por %p1441_p5, %p1440_p4 }
   0xf   :  { %p1443_p7 = pnand %p1442_p6, %p1436_p3 }
  0x11   :  { %1446 = shalt.err (!%p1443_p7)
}
  0x12   :  { %25 = dma.hbm_to_vmem [thread:$0]  %s1701_s1, 128, %s23_s22, [#allocation4]  }
  0x13   :  { %s1447_s13 = scalar_lea.hbm %s1702_s2, 512 }
  0x14   :  { %p1448_p8 = scmp.ne.s32.totalorder %s1702_s2, %s1447_s13  ;;  %p1451_p9 = scmp.lt.u32.totalorder %s1447_s13, %s1702_s2 }
  0x16   :  { %p1453_p10 = pnand %p1451_p9, %p1448_p8 }
  0x18   :  { %1456 = shalt.err (!%p1453_p10)
}
  0x19   :  { %s1457_s18 = scalar_lea.vmem %s1543_s24, 512  ;;  %p1462_p12 = scmp.lt.s32.totalorder %s1543_s24, %s1543_s24 }
  0x1a   :  { %p1458_p11 = scmp.ne.s32.totalorder %s1543_s24, %s1457_s18  ;;  %p1463_p13 = scmp.lt.s32.totalorder %s1457_s18, %s1457_s18 }
  0x1c   :  { %p1464_p0 = por %p1463_p13, %p1462_p12 }
  0x1e   :  { %p1465_p1 = pnand %p1464_p0, %p1458_p11 }
  0x20   :  { %1468 = shalt.err (!%p1465_p1)
}
  0x21   :  { %s1499_s1 = smov 128   ;;  %s1500_s19 = smov 8  }
  0x22   :  { %37 = dma.hbm_to_vmem [thread:$0]  %s1702_s2, 512, %s1543_s24, [#allocation7], %s1499_s1, %s1499_s1, %s1500_s19  }
  0x23   :  { %1491 = dma.done.wait [#allocation4], 128  }
  0x24   :  { %1492 = vsyncadd [#allocation4], 4294967168 }
  0x25   :  { %1493 = dma.done.wait [#allocation7], 512  }
  0x26   :  { %1494 = vsyncadd [#allocation7], 4294966784  ;;  %v1501_v0 = vmov 0.0|0.0   ;;  %vm1502_vm0 = vmmov 0   ;;  %v1503_v1 = vmov 0.0   ;;  %vm60_vm1 = vcmask 64512  }
  0x27   :  { %1320 = vmatprep.subr.bf16.mxu1 %v1501_v0  ;;  %1196 = vmatprep.mubr.msk.f32.mxu1 %vm1502_vm0, %v1503_v1  ;;  %v52_v2 = vld [vmem:[#allocation3] sm:$0xff]  ;;  %v50_v3 = vld [vmem:[%s1700_s0] sm:$0xff]  ;;  %v51_v4 = vld [vmem:[%s1700_s0 + $0x8] sm:$0xff]  ;;  %vm142_vm2 = vcmask 261120   ;;  %s1504_s10 = smov 96   ;;  %vm845_vm3 = vcmask 58368  }
  0x28   :  { %1183 = vmatprep.subr.mxu0 %v52_v2  ;;  %1185 = vmatprep.mubr.msk.f32.mxu0 %vm60_vm1, %v50_v3  ;;  %v145_v5 = vld [vmem:[#allocation6] sm:$0xff]  ;;  %v146_v6 = vld [vmem:[#allocation6 + $0x8] sm:$0xff]  ;;  %v147_v7 = vld [vmem:[#allocation6 + $0x10] sm:$0xff] }
  0x29   :  { %1184 = vmatpush3.msra.mxu0 %v52_v2  ;;  %v1583_v8 = vpack.c.bf16 %v146_v6, %v145_v5  ;;  %v148_v9 = vld [vmem:[#allocation6 + $0x18] sm:$0xff]  ;;  %v1105_v11 = vld [vmem:[%s1703_s3] ss:$0 sm:$0xff]  ;;  %v150_v52 = vld [vmem:[%s1704_s4 + $0x8] sm:$0xff] }
  0x2a   :  { %1186 = vmatmul.mubr.msk.f32.vlgmr.msra.gmra.mrb[0].mxu0 %vm60_vm1, %v51_v4  ;;  %1326 = vmatprep.subr.bf16.mxu0 %v1501_v0  ;;  %v1587_v10 = vpack.c.bf16 %v148_v9, %v147_v7  ;;  %v149_v51 = vld [vmem:[%s1704_s4] sm:$0xff]  ;;  %v151_v53 = vld [vmem:[%s1704_s4 + $0x10] sm:$0xff]  ;;  %v152_v55 = vld [vmem:[%s1704_s4 + $0x18] sm:$0xff] }
  0x2b   :  { %1322 = vmatpush3.bf16.msra.mxu1 %v1583_v8  ;;  %1328 = vmatpush3.bf16.msra.mxu0 %v1583_v8  ;;  %v1369_v54 = vpack.c.bf16 %v150_v52, %v149_v51  ;;  %v1372_v56 = vpack.c.bf16 %v152_v55, %v151_v53  ;;  %v1115_v62 = vld [vmem:[%s1705_s5] ss:$0 sm:$0xff]  ;;  %s1505_s5 = smov [#allocation8]  }
  0x2c   :  { %1323 = vmatprep.subr.bf16.mxu1 %v1501_v0  ;;  %1329 = vmatprep.subr.bf16.mxu0 %v1501_v0  ;;  %s1092_s11 = sshll.u32 %s1505_s5, 4  ;;  %s1093_s11 = int_to_ptr.vmem [resolvable:$true] %s1092_s11 }
  0x2d   :  { %1207 = vmatprep.mubr.msk.f32.mxu0 %vm1502_vm0, %v1503_v1  ;;  %s1469_s12 = scalar_lea.vmem %s1093_s11, 128  ;;  %p1474_p3 = scmp.lt.s32.totalorder %s1093_s11, %s1093_s11 }
  0x2e   :  { %p1470_p2 = scmp.ne.s32.totalorder %s1093_s11, %s1469_s12  ;;  %p1475_p4 = scmp.lt.s32.totalorder %s1469_s12, %s1469_s12 }
  0x2f   :  { %1325 = vmatpush3.bf16.msra.mxu1 %v1587_v10  ;;  %1331 = vmatpush3.bf16.msra.mxu0 %v1587_v10 }
  0x30   :  { %1332 = vmatprep.subr.bf16.mxu1 %v1501_v0  ;;  %1338 = vmatprep.subr.bf16.mxu0 %v1501_v0  ;;  %p1476_p5 = por %p1475_p4, %p1474_p3 }
  0x32   :  { %1197 = vmatmul.mubr.f32.vlgmr.msra.gmra.mrb[0].mxu1 %v1503_v1  ;;  %p1477_p6 = pnand %p1476_p5, %p1470_p2 }
  0x33   :  { %1334 = vmatpush3.bf16.msra.mxu1 %v1583_v8  ;;  %1218 = vmatprep.mubr.msk.f32.mxu1 %vm1502_vm0, %v1503_v1 }
  0x34   :  { %1335 = vmatprep.subr.bf16.mxu1 %v1501_v0 }
  0x37   :  { %1337 = vmatpush3.bf16.msra.mxu1 %v1587_v10 }
  0x38   :  { %1344 = vmatprep.subr.bf16.mxu1 %v1501_v0 }
  0xfd   :  { %v1187_v12 = vpop.f32.mrb[0].mxu0 }
  0xfe   :  { %v139_v13 = vadd.f32 %v1187_v12, %v1105_v11  ;;  %v133_v14 = vpop.f32.mrb[1].mxu0 }
  0xff   :  { %v134_v15 = vadd.f32 %v1105_v11, %v133_v14 }
 0x100   :  { %144 = vst.msk [vmem:[#allocation2 + $0x8] sm:$0xff] %vm142_vm2, %v139_v13 }
 0x101   :  { %143 = vst.msk [vmem:[#allocation2] sm:$0xff] %vm142_vm2, %v134_v15 }
 0x105   :  { %v224_v16 = vpop.f32.mrb[0].mxu1 }
 0x106   :  { %v1198_v17 = vpop.f32.mrb[1].mxu1 }
 0x107   :  { %v458_v36 = vld [vmem:[#allocation2 + $0x8] sm:$0x3]  ;;  %v534_v41 = vld [vmem:[#allocation2 + $0xa] sm:$0x3]  ;;  %v610_v46 = vld [vmem:[#allocation2 + $0xc] sm:$0x3] }
 0x108   :  { %v154_v18 = vld [vmem:[#allocation2] sm:$0x3]  ;;  %v230_v21 = vld [vmem:[#allocation2 + $0x2] sm:$0x3]  ;;  %v306_v26 = vld [vmem:[#allocation2 + $0x4] sm:$0x3] }
 0x109   :  { %v228_v19 = vadd.f32 %v224_v16, %v154_v18  ;;  %v382_v31 = vld [vmem:[#allocation2 + $0x6] sm:$0x3]  ;;  %v686_v57 = vld [vmem:[#allocation2 + $0xe] sm:$0x3] }
 0x10b   :  { %1403 = vtanh.f32 %v228_v19 }
 0x115   :  { %v1404_v20 = vpop.eup %1403 }
 0x116   :  { %1208 = vmatmul.mubr.msk.f32.vlgmr.msra.gmra.mrb[2].mxu0 %vm142_vm2, %v1404_v20 }
 0x117   :  { %1340 = vmatpush3.bf16.msra.mxu0 %v1583_v8  ;;  %1229 = vmatprep.mubr.msk.f32.mxu0 %vm1502_vm0, %v1503_v1 }
 0x118   :  { %1341 = vmatprep.subr.bf16.mxu0 %v1501_v0 }
 0x11b   :  { %1343 = vmatpush3.bf16.msra.mxu0 %v1587_v10 }
 0x11c   :  { %1350 = vmatprep.subr.bf16.mxu0 %v1501_v0 }
 0x1e9   :  { %v300_v22 = vpop.f32.mrb[2].mxu0 }
 0x1ea   :  { %v304_v23 = vadd.f32 %v300_v22, %v230_v21  ;;  %v1209_v24 = vpop.f32.mrb[3].mxu0 }
 0x1ec   :  { %1405 = vtanh.f32 %v304_v23 }
 0x1f6   :  { %v1406_v25 = vpop.eup %1405 }
 0x1f7   :  { %1219 = vmatmul.mubr.msk.f32.vlgmr.msra.gmra.mrb[2].mxu1 %vm142_vm2, %v1406_v25 }
 0x1f8   :  { %1346 = vmatpush3.bf16.msra.mxu1 %v1583_v8  ;;  %1240 = vmatprep.mubr.msk.f32.mxu1 %vm1502_vm0, %v1503_v1 }
 0x1f9   :  { %1347 = vmatprep.subr.bf16.mxu1 %v1501_v0 }
 0x1fc   :  { %1349 = vmatpush3.bf16.msra.mxu1 %v1587_v10 }
 0x1fd   :  { %1356 = vmatprep.subr.bf16.mxu1 %v1501_v0 }
 0x2ca   :  { %v376_v27 = vpop.f32.mrb[2].mxu1 }
 0x2cb   :  { %v380_v28 = vadd.f32 %v376_v27, %v306_v26  ;;  %v1220_v29 = vpop.f32.mrb[3].mxu1 }
 0x2cd   :  { %1407 = vtanh.f32 %v380_v28 }
 0x2d7   :  { %v1408_v30 = vpop.eup %1407 }
 0x2d8   :  { %1230 = vmatmul.mubr.msk.f32.vlgmr.msra.gmra.mrb[4].mxu0 %vm142_vm2, %v1408_v30 }
 0x2d9   :  { %1352 = vmatpush3.bf16.msra.mxu0 %v1583_v8  ;;  %1251 = vmatprep.mubr.msk.f32.mxu0 %vm1502_vm0, %v1503_v1 }
 0x2da   :  { %1353 = vmatprep.subr.bf16.mxu0 %v1501_v0 }
 0x2dd   :  { %1355 = vmatpush3.bf16.msra.mxu0 %v1587_v10 }
 0x2de   :  { %1362 = vmatprep.subr.bf16.mxu0 %v1501_v0 }
 0x3ab   :  { %v452_v32 = vpop.f32.mrb[4].mxu0 }
 0x3ac   :  { %v456_v33 = vadd.f32 %v452_v32, %v382_v31  ;;  %v1231_v34 = vpop.f32.mrb[5].mxu0 }
 0x3ae   :  { %1409 = vtanh.f32 %v456_v33 }
 0x3b8   :  { %v1410_v35 = vpop.eup %1409 }
 0x3b9   :  { %1241 = vmatmul.mubr.msk.f32.vlgmr.msra.gmra.mrb[4].mxu1 %vm142_vm2, %v1410_v35 }
 0x3ba   :  { %1358 = vmatpush3.bf16.msra.mxu1 %v1583_v8  ;;  %1262 = vmatprep.mubr.msk.f32.mxu1 %vm1502_vm0, %v1503_v1 }
 0x3bb   :  { %1359 = vmatprep.subr.bf16.mxu1 %v1501_v0 }
 0x3be   :  { %1361 = vmatpush3.bf16.msra.mxu1 %v1587_v10 }
 0x3bf   :  { %1368 = vmatprep.subr.bf16.mxu1 %v1501_v0 }
 0x48c   :  { %v528_v37 = vpop.f32.mrb[4].mxu1 }
 0x48d   :  { %v532_v38 = vadd.f32 %v528_v37, %v458_v36  ;;  %v1242_v39 = vpop.f32.mrb[5].mxu1 }
 0x48f   :  { %1411 = vtanh.f32 %v532_v38 }
 0x499   :  { %v1412_v40 = vpop.eup %1411 }
 0x49a   :  { %1252 = vmatmul.mubr.msk.f32.vlgmr.msra.gmra.mrb[6].mxu0 %vm142_vm2, %v1412_v40 }
 0x49b   :  { %1364 = vmatpush3.bf16.msra.mxu0 %v1583_v8  ;;  %1273 = vmatprep.mubr.msk.f32.mxu0 %vm1502_vm0, %v1503_v1 }
 0x49c   :  { %1365 = vmatprep.subr.bf16.mxu0 %v1501_v0 }
 0x49f   :  { %1367 = vmatpush3.bf16.msra.mxu0 %v1587_v10 }
 0x4a0   :  { %1374 = vmatprep.subr.bf16.mxu0 %v1501_v0 }
 0x56d   :  { %v604_v42 = vpop.f32.mrb[6].mxu0 }
 0x56e   :  { %v608_v43 = vadd.f32 %v604_v42, %v534_v41  ;;  %v1253_v44 = vpop.f32.mrb[7].mxu0 }
 0x570   :  { %1413 = vtanh.f32 %v608_v43 }
 0x57a   :  { %v1414_v45 = vpop.eup %1413 }
 0x57b   :  { %1263 = vmatmul.mubr.msk.f32.vlgmr.msra.gmra.mrb[6].mxu1 %vm142_vm2, %v1414_v45 }
 0x57c   :  { %1284 = vmatprep.mubr.msk.f32.mxu1 %vm1502_vm0, %v1503_v1  ;;  %1370 = vmatpush3.bf16.msra.mxu1 %v1369_v54 }
 0x57d   :  { %1371 = vmatprep.subr.bf16.mxu1 %v1501_v0 }
 0x580   :  { %1373 = vmatpush3.bf16.msra.mxu1 %v1372_v56 }
 0x581   :  { %1380 = vmatprep.subr.bf16.mxu1 %v1501_v0 }
 0x64e   :  { %v680_v47 = vpop.f32.mrb[6].mxu1 }
 0x64f   :  { %v684_v48 = vadd.f32 %v680_v47, %v610_v46  ;;  %v1264_v49 = vpop.f32.mrb[7].mxu1 }
 0x651   :  { %1415 = vtanh.f32 %v684_v48 }
 0x65b   :  { %v1416_v50 = vpop.eup %1415 }
 0x65c   :  { %1274 = vmatmul.mubr.msk.f32.vlgmr.msra.gmra.mrb[8].mxu0 %vm142_vm2, %v1416_v50 }
 0x65d   :  { %1295 = vmatprep.mubr.msk.f32.mxu0 %vm1502_vm0, %v1503_v1  ;;  %1376 = vmatpush3.bf16.msra.mxu0 %v1369_v54 }
 0x65e   :  { %1377 = vmatprep.subr.bf16.mxu0 %v1501_v0 }
 0x661   :  { %1379 = vmatpush3.bf16.msra.mxu0 %v1372_v56 }
 0x662   :  { %1386 = vmatprep.subr.bf16.mxu0 %v1501_v0 }
 0x72f   :  { %v756_v58 = vpop.f32.mrb[8].mxu0 }
 0x730   :  { %v760_v59 = vadd.f32 %v756_v58, %v686_v57  ;;  %v1275_v60 = vpop.f32.mrb[9].mxu0 }
 0x732   :  { %1417 = vtanh.f32 %v760_v59 }
 0x73c   :  { %v1418_v61 = vpop.eup %1417 }
 0x73d   :  { %1285 = vmatmul.mubr.msk.f32.vlgmr.msra.gmra.mrb[8].mxu1 %vm142_vm2, %v1418_v61 }
 0x73e   :  { %1382 = vmatpush3.bf16.msra.mxu1 %v1369_v54  ;;  %1306 = vmatprep.mubr.msk.f32.mxu1 %vm1502_vm0, %v1503_v1 }
 0x73f   :  { %1383 = vmatprep.subr.bf16.mxu1 %v1501_v0 }
 0x742   :  { %1385 = vmatpush3.bf16.msra.mxu1 %v1372_v56 }
 0x810   :  { %v837_v63 = vpop.f32.mrb[8].mxu1 }
 0x811   :  { %v838_v2 = vadd.f32 %v1115_v62, %v837_v63  ;;  %v1286_v3 = vpop.f32.mrb[9].mxu1 }
 0x813   :  { %1419 = vtanh.f32 %v838_v2  ;;  %842 = vrot.lane.b32.xlu0 %v838_v2, %s1504_s10 }
 0x81d   :  { %v1420_v4 = vpop.eup %1419 }
 0x81e   :  { %1296 = vmatmul.mubr.msk.f32.vlgmr.msra.gmra.mrb[10].mxu0 %vm142_vm2, %v1420_v4 }
 0x81f   :  { %1388 = vmatpush3.bf16.msra.mxu0 %v1369_v54  ;;  %1317 = vmatprep.mubr.msk.f32.mxu0 %vm1502_vm0, %v1503_v1 }
 0x820   :  { %1389 = vmatprep.subr.bf16.mxu0 %v1501_v0 }
 0x823   :  { %1391 = vmatpush3.bf16.msra.mxu0 %v1372_v56 }
 0x885   :  { %v843_v5 = vpop.permute.xlu0 %842 }
 0x886   :  { %846 = vst.msk [vmem:[#allocation8] sm:$0x3] %vm845_vm3, %v843_v5 }
 0x8f1   :  { %v917_v6 = vpop.f32.mrb[10].mxu0 }
 0x8f2   :  { %v918_v7 = vadd.f32 %v1115_v62, %v917_v6  ;;  %v1297_v8 = vpop.f32.mrb[11].mxu0 }
 0x8f4   :  { %1421 = vtanh.f32 %v918_v7  ;;  %922 = vrot.lane.b32.xlu0 %v918_v7, %s1504_s10 }
 0x8fe   :  { %v1422_v9 = vpop.eup %1421 }
 0x8ff   :  { %1307 = vmatmul.mubr.msk.f32.vlgmr.msra.gmra.mrb[10].mxu1 %vm142_vm2, %v1422_v9 }
 0x966   :  { %v923_v10 = vpop.permute.xlu0 %922 }
 0x967   :  { %926 = vst.msk [vmem:[#allocation8 + $0x2] sm:$0x3] %vm845_vm3, %v923_v10 }
 0x9d2   :  { %v997_v1 = vpop.f32.mrb[10].mxu1 }
 0x9d3   :  { %v998_v11 = vadd.f32 %v1115_v62, %v997_v1  ;;  %v1308_v0 = vpop.f32.mrb[11].mxu1 }
 0x9d5   :  { %1423 = vtanh.f32 %v998_v11  ;;  %1002 = vrot.lane.b32.xlu1 %v998_v11, %s1504_s10 }
 0x9df   :  { %v1424_v12 = vpop.eup %1423 }
 0x9e0   :  { %1318 = vmatmul.mubr.msk.f32.vlgmr.msra.gmra.mrb[12].mxu0 %vm142_vm2, %v1424_v12 }
 0xa47   :  { %v1003_v13 = vpop.permute.xlu1 %1002 }
 0xa48   :  { %1006 = vst.msk [vmem:[#allocation8 + $0x4] sm:$0x3] %vm845_vm3, %v1003_v13 }
 0xab3   :  { %v1077_v14 = vpop.f32.mrb[12].mxu0 }
 0xab4   :  { %v1078_v15 = vadd.f32 %v1115_v62, %v1077_v14  ;;  %v1319_v16 = vpop.f32.mrb[13].mxu0 }
 0xab6   :  { %1082 = vrot.lane.b32.xlu1 %v1078_v15, %s1504_s10 }
 0xb28   :  { %v1083_v17 = vpop.permute.xlu1 %1082 }
 0xb29   :  { %1086 = vst.msk [vmem:[#allocation8 + $0x6] sm:$0x3] %vm845_vm3, %v1083_v17 }
 0xb2a   :  { %1480 = shalt.err (!%p1477_p6)
}
 0xb2b   :  { %s1481_s15 = scalar_lea.hbm %s1706_s6, 128 }
 0xb2c   :  { %p1482_p7 = scmp.ne.s32.totalorder %s1706_s6, %s1481_s15  ;;  %p1485_p8 = scmp.lt.u32.totalorder %s1481_s15, %s1706_s6 }
 0xb2e   :  { %p1487_p9 = pnand %p1485_p8, %p1482_p7 }
 0xb30   :  { %1490 = shalt.err (!%p1487_p9)
}
 0xb31   :  { %s1506_s19 = smov 32   ;;  %s1507_s20 = smov 2  }
 0xb32   :  { %1098 = dma.vmem_to_hbm [thread:$0]  %s1093_s11, 128, %s1706_s6, [#allocation5], %s1506_s19, %s1506_s19, %s1507_s20  }
 0xb33   :  { %1495 = dma.done.wait [#allocation5], 128  }
 0xb34   :  { %1496 = vsyncadd [#allocation5], 4294967168 }
 0xb35   :  { %1102 = vsyncpa [#allocation4], 1 }
 0xb36   :  { %1103 = vsyncpa [#allocation7], 1 }
 0xb37   :  { %1104 = vsyncpa [#allocation5], 1 }

</bundles_post_ra>
